<compile_context>
chip_gen: v6e
topology: v6e:2x2x1
jax: 0.10.0
libtpu: 0.0.40
codegen_flags: <defaults>
</compile_context>

<pallas_src>
import jax
import jax.numpy as jnp
from jax.experimental import pallas as pl
from jax.experimental.pallas import tpu as pltpu


def _se_kernel(x_ref, w_ref, g_ref, o_ref):
    # x_ref: (1, C, T_HW)     one spatial tile of one batch element
    # w_ref: (out_C, C)       keep_x_size 1x1-conv weight
    # g_ref: (1, out_C, 1)    precomputed sigmoid gate for this batch element (f32)
    # o_ref: (1, out_C, T_HW)
    x = x_ref[0]                                              # (C, T_HW)
    w = w_ref[...]                                            # (out_C, C)
    # 1x1 conv == channel matmul.  HW stays on the lane axis, so stores are
    # lane-dense.  With tiny C the MXU K-dim is under-filled, but this op is
    # HBM-bandwidth bound, so MXU utilization is irrelevant.
    x1 = jnp.dot(w, x, preferred_element_type=jnp.float32)    # (out_C, T_HW) f32
    gate = g_ref[0]                                           # (out_C, 1) f32
    o_ref[0] = (x1 * gate).astype(o_ref.dtype)                # broadcast over lanes


def _choose_hw_tile(hw, c, out_c, itemsize, vmem_budget=8 * 1024 * 1024):
    """Largest lane-dense HW tile keeping double-buffered I/O under `vmem_budget`.

    Budget is conservative (8 MiB) so it fits the default scoped-VMEM limit on
    every generation (v5e 16 MiB, v6e/v7x 32 MiB) with headroom.
    """
    if hw % 128 != 0:
        return hw  # small / odd shapes: take the full spatial extent
    per_hw_elem = 2 * (c + out_c) * itemsize  # input + output, double-buffered
    t = 128
    while (hw % (2 * t) == 0) and (2 * t * per_hw_elem <= vmem_budget):
        t *= 2
    return t


def se_layer(x_nchw, w_keep, w_down, w_up):
    """x_nchw: (B, C, H, W); w_keep: (out_C, C); w_down: (C//r, C); w_up: (out_C, C//r)."""
    B, C, H, W = x_nchw.shape
    out_C = w_keep.shape[0]
    HW = H * W

    # (B, C, H, W) -> (B, C, HW): pure reshape, no transpose.
    x_flat = x_nchw.reshape(B, C, HW)
    wk = w_keep.astype(x_flat.dtype)

    # Hoisted squeeze-excite gate (exact rewrite: pool first, then the tiny
    # convdown/convup matmuls).  (B, C) -> (B, C//r) -> sigmoid -> (B, out_C).
    pooled = jnp.mean(x_flat.astype(jnp.float32), axis=-1)        # (B, C)
    y = pooled @ w_down.astype(jnp.float32).T                     # (B, C//r)
    gate = jax.nn.sigmoid(y @ w_up.astype(jnp.float32).T)         # (B, out_C)
    gate = gate[:, :, None].astype(jnp.float32)                   # (B, out_C, 1)

    itemsize = jnp.dtype(x_flat.dtype).itemsize
    t_hw = _choose_hw_tile(HW, C, out_C, itemsize)
    n_hw_tiles = HW // t_hw

    cost = pl.CostEstimate(
        flops=2 * B * HW * C * out_C,
        transcendentals=0,
        bytes_accessed=int(
            B * HW * C * itemsize            # x read
            + out_C * C * itemsize           # weight read
            + B * out_C * 4                  # gate read
            + B * HW * out_C * itemsize      # output write
        ),
    )

    out_flat = pl.pallas_call(
        _se_kernel,
        out_shape=jax.ShapeDtypeStruct((B, out_C, HW), x_flat.dtype),
        grid_spec=pltpu.PrefetchScalarGridSpec(
            num_scalar_prefetch=0,
            grid=(B, n_hw_tiles),
            in_specs=[
                pl.BlockSpec((1, C, t_hw), lambda b, t: (b, 0, t)),
                pl.BlockSpec((out_C, C), lambda b, t: (0, 0)),
                pl.BlockSpec((1, out_C, 1), lambda b, t: (b, 0, 0)),
            ],
            out_specs=pl.BlockSpec((1, out_C, t_hw), lambda b, t: (b, 0, t)),
        ),
        compiler_params=pltpu.CompilerParams(
            dimension_semantics=("parallel", "parallel"),
            vmem_limit_bytes=32 * 1024 * 1024,
        ),
        cost_estimate=cost,
    )(x_flat, wk, gate)

    # (B, out_C, HW) -> (B, out_C, H, W): pure reshape, no transpose.
    return out_flat.reshape(B, out_C, H, W)


def se_layer_ref(x_nchw, w_keep, w_down, w_up):
    """Pure-JAX reference matching the PyTorch forward exactly."""
    x1 = jnp.einsum("bchw,oc->bohw", x_nchw, w_keep)
    y = jnp.einsum("bchw,dc->bdhw", x_nchw, w_down)
    y = jnp.mean(y, axis=(2, 3), keepdims=True)
    y = jax.nn.sigmoid(jnp.einsum("bdhw,od->bohw", y, w_up))
    return x1 * y


if __name__ == "__main__":
    # SELayer(channel=4, out_channel=8, reduction=2)
    B, C, H, W = 2, 4, 16, 16
    out_C, reduction = 8, 2
    Cr = C // reduction

    key = jax.random.PRNGKey(0)
    kx, kk, kd, ku = jax.random.split(key, 4)
    x = jax.random.normal(kx, (B, C, H, W), dtype=jnp.float32)
    # shapes match nn.Conv2d(.., 1, bias=False).weight with the 1x1 dims squeezed
    w_keep = jax.random.normal(kk, (out_C, C), dtype=jnp.float32) * 0.1
    w_down = jax.random.normal(kd, (Cr, C), dtype=jnp.float32) * 0.1
    w_up = jax.random.normal(ku, (out_C, Cr), dtype=jnp.float32) * 0.1

    out = jax.jit(se_layer)(x, w_keep, w_down, w_up)
    jax.block_until_ready(out)

    ref = se_layer_ref(x, w_keep, w_down, w_up)
    assert out.shape == (B, out_C, H, W), out.shape
    assert jnp.allclose(out, ref, atol=1e-5, rtol=1e-5), "mismatch vs reference"

    print("KERNEL_OK")
</pallas_src>

<mosaic_0001>
module attributes {stable_mosaic.version = 11 : i64} {
  func.func @_se_kernel(%arg0: i32, %arg1: i32, %arg2: memref<1x4x256xf32, #tpu.memory_space<vmem>>, %arg3: memref<8x4xf32, #tpu.memory_space<vmem>>, %arg4: memref<1x8x1xf32, #tpu.memory_space<vmem>>, %arg5: memref<1x8x256xf32, #tpu.memory_space<vmem>>) attributes {dimension_semantics = [#tpu.dimension_semantics<parallel>, #tpu.dimension_semantics<parallel>], iteration_bounds = array<i64: 2, 1>, scalar_prefetch = 0 : i64, scratch_operands = 0 : i64, tpu.core_type = #tpu.core_type<tc>, window_params = [{transform_indices = @transform_0, window_bounds = array<i64: 1, 4, 256>}, {pipeline_mode = #tpu.pipeline_mode<synchronous>, transform_indices = @transform_1, window_bounds = array<i64: 8, 4>}, {transform_indices = @transform_2, window_bounds = array<i64: 1, 8, 1>}, {transform_indices = @transform_3, window_bounds = array<i64: 1, 8, 256>}]} {
    %c0 = arith.constant 0 : index
    %c0_0 = arith.constant 0 : index
    %c0_1 = arith.constant 0 : index
    %0 = vector.load %arg2[%c0, %c0_0, %c0_1] : memref<1x4x256xf32, #tpu.memory_space<vmem>>, vector<1x4x256xf32>
    %1 = vector.shape_cast %0 : vector<1x4x256xf32> to vector<4x256xf32>
    %c0_2 = arith.constant 0 : index
    %c0_3 = arith.constant 0 : index
    %2 = vector.load %arg3[%c0_2, %c0_3] : memref<8x4xf32, #tpu.memory_space<vmem>>, vector<8x4xf32>
    %cst = arith.constant dense<0.000000e+00> : vector<8x256xf32>
    %3 = tpu.matmul %2, %1, %cst {dimension_numbers = #tpu.dot_dimension_numbers<[1], [0], [0], [1], [0, 0, 1, 1], [], []>} : vector<8x4xf32>, vector<4x256xf32>, vector<8x256xf32> -> vector<8x256xf32>
    %c0_4 = arith.constant 0 : index
    %c0_5 = arith.constant 0 : index
    %c0_6 = arith.constant 0 : index
    %4 = vector.load %arg4[%c0_4, %c0_5, %c0_6] : memref<1x8x1xf32, #tpu.memory_space<vmem>>, vector<1x8x1xf32>
    %5 = vector.shape_cast %4 : vector<1x8x1xf32> to vector<8x1xf32>
    %6 = vector.broadcast %5 : vector<8x1xf32> to vector<8x256xf32>
    %7 = arith.mulf %3, %6 : vector<8x256xf32>
    %c0_7 = arith.constant 0 : index
    %c0_8 = arith.constant 0 : index
    %c0_9 = arith.constant 0 : index
    %8 = vector.load %arg5[%c0_7, %c0_8, %c0_9] : memref<1x8x256xf32, #tpu.memory_space<vmem>>, vector<1x8x256xf32>
    %9 = vector.shape_cast %8 : vector<1x8x256xf32> to vector<8x256xf32>
    %10 = vector.shape_cast %7 : vector<8x256xf32> to vector<1x8x256xf32>
    tpu.vector_store %arg5[%c0_7, %c0_8, %c0_9], %10 {strides = array<i32>} : memref<1x8x256xf32, #tpu.memory_space<vmem>>, vector<1x8x256xf32>,
    return
  }
  func.func @transform_0(%arg0: i32, %arg1: i32) -> (i32, i32, i32) {
    %c0_i32 = arith.constant 0 : i32
    %c0_i32_0 = arith.constant 0 : i32
    return %arg0, %c0_i32, %arg1 : i32, i32, i32
  }
  func.func @transform_1(%arg0: i32, %arg1: i32) -> (i32, i32) {
    %c0_i32 = arith.constant 0 : i32
    %c0_i32_0 = arith.constant 0 : i32
    %c0_i32_1 = arith.constant 0 : i32
    return %c0_i32, %c0_i32_0 : i32, i32
  }
  func.func @transform_2(%arg0: i32, %arg1: i32) -> (i32, i32, i32) {
    %c0_i32 = arith.constant 0 : i32
    %c0_i32_0 = arith.constant 0 : i32
    %c0_i32_1 = arith.constant 0 : i32
    return %arg0, %c0_i32, %c0_i32_0 : i32, i32, i32
  }
  func.func @transform_3(%arg0: i32, %arg1: i32) -> (i32, i32, i32) {
    %c0_i32 = arith.constant 0 : i32
    %c0_i32_0 = arith.constant 0 : i32
    return %arg0, %c0_i32, %arg1 : i32, i32, i32
  }
}

</mosaic_0001>

<bundles_post_ra>
// kernel: se_layer.1
= control target key start
LH: loop header
LB: loop body
LE: loop exit
PB: predicated region body
PF: predicated region fallthrough
CT: control target
= control target key end

     0   :  { %s511_s12 = smov 0   ;;  %s513_s13 = smov 0   ;;  %s550_s0 = inlined_call_operand.vmem [shape: f32[2,4,256], index: 0, kind: input, shape index: {}]   ;;  %s551_s1 = inlined_call_operand.vmem [shape: f32[8,4], index: 1, kind: input, shape index: {}]   ;;  %s552_s2 = inlined_call_operand.vmem [shape: f32[2,8,1], index: 2, kind: input, shape index: {}]   ;;  %s553_s3 = inlined_call_operand.vmem [shape: f32[2,8,256], index: 3, kind: output, shape index: {}]  }
   0x1   :  { %s515_s14 = smov 0  }
   0x2 LB: > { %s25_s15 = sadd.s32 1, %s483_s13  ;;  %p424_p0 = scmp.ge.s32.totalorder %s487_s14, 1  ;;  %s487_s14 = sphi %s515_s14, %s13_s14   ;;  %s483_s13 = sphi %s513_s13, %s555_s13   ;;  %s479_s12 = sphi %s511_s12, %s554_s12  }
   0x3   : > { %p27_p1 = scmp.ge.s32.totalorder %s25_s15, 2  ;;  %p167_p2 = scmp.lt.s32.totalorder %s487_s14, 3 }
   0x5   : > { %s557_s15 = smov (%p27_p1, %s25_s15), 0  ;;  %p168_p3 = pnand %p424_p0, %p167_p2 }
   0x6   : > { %p204_p4 = scmp.lt.s32.totalorder (!%p168_p3), %s479_s12, 1 }
   0x7   : > { %171 = sbr.rel (%p168_p3) target bundleno = 218 (0xda), region = 32 }
   0xc   : > { %v489_v0 = vmov 0.0   ;;  %v490_v1 = vmov 0   ;;  %s559_s12 = smov (!%p204_p4, %s479_s12), 1  ;;  %vm235_vm0 = vcmask 1043456   ;;  %v228_v5 = vld [vmem:[%s551_s1] sm:$0xff]  ;;  %vm231_vm1 = vcmask 31744  }
   0xd   : > { %304 = vmatprep.mubr.f32.mxu0 %v489_v0  ;;  %463 = vset.pattern.permute.xlu0 %v490_v1  ;;  %s435_s16 = sshll.u32 %s559_s12, 3  ;;  %s436_s25 = sshll.u32 %s559_s12, 4 }
   0xe   : > { %s211_s19 = scalar_lea.vmem %s550_s0, %s435_s16  ;;  %s216_s22 = scalar_lea.vmem %s552_s2, %s435_s16 }
   0xf   : > { %v227_v2 = vld [vmem:[%s211_s19] sm:$0xff]  ;;  %s225_s28 = scalar_lea.vmem %s553_s3, %s436_s25 }
  0x10   : > { %v311_v3 = vld [vmem:[%s216_s22] sm:$0xff]  ;;  %v230_v4 = vcombine.high %v227_v2, %v227_v2 }
  0x11   : > { %314 = vperm.xlu0 %463, %v311_v3  }
  0x12   : > { %430 = vmatprep.subr.msk.mxu0 %vm235_vm0, %v230_v4 }
  0x13   : > { %431 = vmatpush1.msk.msra.mxu0 %vm235_vm0, %v227_v2 }
  0x14   : > { %432 = vmatmul.mubr.msk.f32.vlgmr.msra.gmra.mxu0 %vm231_vm1, %v228_v5 }
  0x8c   : > { %v315_v6 = vpop.permute.xlu0 %314 }
  0xd4   : > { %v306_v7 = vpop.f32.mrf.mxu0 }
  0xd5   : > { %v317_v8 = vmul.f32 %v315_v6, %v306_v7 }
  0xd6   : > { %v308_v9 = vpop.f32.mrf.mxu0 }
  0xd7   : > { %319 = vst [vmem:[%s225_s28] sm:$0xff] %v317_v8  ;;  %v318_v10 = vmul.f32 %v315_v6, %v308_v9 }
  0xd9   : > { %320 = vst [vmem:[%s225_s28 + $0x8] sm:$0xff] %v318_v10 }
  0xda PF: > { %s13_s14 = sadd.s32 1, %s487_s14   ;;  %s554_s12 = smov %s483_s13 }
  0xdb   : > { %p10_p5 = scmp.ge.s32.totalorder %s13_s14, 4   ;;  %s555_s13 = smov %s557_s15 }
  0xdd   :  { %12 = sbr.rel (!%p10_p5) target bundleno = 2 (0x2), region = 65 }

</bundles_post_ra>
